<compile_context>
chip_gen: v6e
topology: v6e:2x2x1
jax: 0.10.0
libtpu: 0.0.40
codegen_flags: <defaults>
</compile_context>

<pallas_src>
import functools
import math

import jax
import jax.numpy as jnp
from jax.experimental import pallas as pl
from jax.experimental.pallas import tpu as pltpu

LOG_2PI = math.log(2.0 * math.pi)


def _ru(x, m):
    return (x + m - 1) // m * m


# ---------------------------------------------------------------------------
# In-kernel helpers
# ---------------------------------------------------------------------------
def _conv_taps(xcs_ref, w_ref, H, W):
    """3x3 'valid' conv over a column-shifted padded input.

    xcs_ref : (1, 3, (H+2)*W, Cin) bf16 -- plane dj holds columns dj..dj+W-1 of
              the spatially padded image with (row, col) flattened, so tap
              (di, dj) is the contiguous row range [di*W, di*W + H*W).
    w_ref   : (9, Cin, Cout) bf16, tap index di*3 + dj.
    Returns an (H*W, Cout) float32 accumulator (bias NOT added).
    """
    cout = w_ref.shape[-1]
    acc = jnp.zeros((H * W, cout), jnp.float32)
    for dj in range(3):
        for di in range(3):
            xs = xcs_ref[0, dj, di * W:di * W + H * W, :]
            acc = acc + jnp.dot(xs, w_ref[di * 3 + dj],
                                preferred_element_type=jnp.float32)
    return acc


# ---------------------------------------------------------------------------
# Pallas kernels
# ---------------------------------------------------------------------------
def _conv3x3_kernel(xcs_ref, w_ref, b_ref, o_ref, *, H, W, relu):
    acc = _conv_taps(xcs_ref, w_ref, H, W) + b_ref[...]
    if relu:
        acc = jnp.maximum(acc, 0.0)
    o_ref[...] = acc.astype(o_ref.dtype).reshape(o_ref.shape)


def _conv3x3_mm_kernel(xcs_ref, w1_ref, b1_ref, w2_ref, b2_ref, o_ref, *, H, W):
    """3x3 conv + bias + ReLU fused with a 1x1 conv (resident W2) + bias + ReLU."""
    h1 = _conv_taps(xcs_ref, w1_ref, H, W) + b1_ref[...]
    h1 = jnp.maximum(h1, 0.0)
    h2 = jnp.dot(h1.astype(jnp.bfloat16), w2_ref[...],
                 preferred_element_type=jnp.float32) + b2_ref[...]
    h2 = jnp.maximum(h2, 0.0)
    o_ref[...] = h2.astype(o_ref.dtype).reshape(o_ref.shape)


def _zeroconv_coupling_kernel(xcs_ref, w_ref, b_ref, inb_ref, outb_ref, ld_ref,
                              *, H, W):
    """ZeroConv2d (gain folded into w/b) fused with the affine-coupling epilogue."""
    acc = _conv_taps(xcs_ref, w_ref, H, W) + b_ref[...]        # (H*W, c) f32
    c = acc.shape[-1]
    ch = c // 2
    xs = acc[:, :ch] + 2.0                                      # log_s + 2
    t = acc[:, ch:]
    e = jnp.exp(-jnp.abs(xs))                                   # shared transcendental
    recip = 1.0 / (1.0 + e)
    s = jnp.where(xs >= 0, recip, e * recip)                    # sigmoid(xs)
    logsig = jnp.minimum(xs, 0.0) - jnp.log(1.0 + e)            # log(sigmoid(xs))
    inb = inb_ref[0].astype(jnp.float32)                        # (H*W, ch)
    out_b = (inb + t) * s
    outb_ref[...] = out_b.astype(outb_ref.dtype).reshape(outb_ref.shape)
    ld_ref[...] = jnp.zeros(ld_ref.shape, jnp.float32) + jnp.sum(logsig)


def _gauss_kernel(x_ref, prior_ref, o_ref, *, c):
    x = x_ref[0].astype(jnp.float32)                            # (H*W, c)
    pr = prior_ref[0].astype(jnp.float32)                       # (H*W, 2c)
    mean = pr[:, :c]
    log_sd = pr[:, c:]
    diff = x - mean
    lp = (-0.5 * LOG_2PI) - log_sd - 0.5 * diff * diff * jnp.exp(-2.0 * log_sd)
    o_ref[...] = jnp.zeros(o_ref.shape, jnp.float32) + jnp.sum(lp)


def _stats_kernel(x_ref, s1_ref, s2_ref):
    @pl.when(pl.program_id(0) == 0)
    def _():
        s1_ref[...] = jnp.zeros_like(s1_ref)
        s2_ref[...] = jnp.zeros_like(s2_ref)
    x = x_ref[...]
    s1_ref[...] += jnp.sum(x, axis=0, keepdims=True)
    s2_ref[...] += jnp.sum(x * x, axis=0, keepdims=True)


def _mm_bias_kernel(x_ref, w_ref, b_ref, o_ref):
    o_ref[...] = jnp.dot(x_ref[...], w_ref[...],
                         preferred_element_type=jnp.float32) + b_ref[...]


# ---------------------------------------------------------------------------
# Wrappers
# ---------------------------------------------------------------------------
def _col_shifted(x_nhwc, pad_value):
    """NHWC -> spatially padded, column-shifted (N, 3, (H+2)*W, C)."""
    xp = jnp.pad(x_nhwc, ((0, 0), (1, 1), (1, 1), (0, 0)),
                 constant_values=pad_value)
    n, hp, wp, c = xp.shape
    w = wp - 2
    cols = [xp[:, :, dj:dj + w, :].reshape(n, 1, hp * w, c) for dj in range(3)]
    return jnp.concatenate(cols, axis=1)


def conv3x3(xcs, w, b, H, W, out_dtype, relu=False):
    n, _, hpw, cin = xcs.shape
    cout = w.shape[-1]
    return pl.pallas_call(
        functools.partial(_conv3x3_kernel, H=H, W=W, relu=relu),
        out_shape=jax.ShapeDtypeStruct((n, H * W, cout), out_dtype),
        grid=(n,),
        in_specs=[
            pl.BlockSpec((1, 3, hpw, cin), lambda i: (i, 0, 0, 0)),
            pl.BlockSpec((9, cin, cout), lambda i: (0, 0, 0)),
            pl.BlockSpec((1, cout), lambda i: (0, 0)),
        ],
        out_specs=pl.BlockSpec((1, H * W, cout), lambda i: (i, 0, 0)),
        compiler_params=pltpu.CompilerParams(dimension_semantics=("parallel",)),
    )(xcs, w, b)


def conv3x3_mm(xcs, w1, b1, w2, b2, H, W):
    n, _, hpw, cin = xcs.shape
    cmid = w1.shape[-1]
    cout = w2.shape[-1]
    return pl.pallas_call(
        functools.partial(_conv3x3_mm_kernel, H=H, W=W),
        out_shape=jax.ShapeDtypeStruct((n, H * W, cout), jnp.bfloat16),
        grid=(n,),
        in_specs=[
            pl.BlockSpec((1, 3, hpw, cin), lambda i: (i, 0, 0, 0)),
            pl.BlockSpec((9, cin, cmid), lambda i: (0, 0, 0)),
            pl.BlockSpec((1, cmid), lambda i: (0, 0)),
            pl.BlockSpec((cmid, cout), lambda i: (0, 0)),
            pl.BlockSpec((1, cout), lambda i: (0, 0)),
        ],
        out_specs=pl.BlockSpec((1, H * W, cout), lambda i: (i, 0, 0)),
        compiler_params=pltpu.CompilerParams(dimension_semantics=("parallel",)),
    )(xcs, w1, b1, w2, b2)


def zeroconv_coupling(xcs, wz, bz, in_b_flat, H, W):
    n, _, hpw, cmid = xcs.shape
    cout = wz.shape[-1]
    ch = cout // 2
    out_b, ld = pl.pallas_call(
        functools.partial(_zeroconv_coupling_kernel, H=H, W=W),
        out_shape=(jax.ShapeDtypeStruct((n, H * W, ch), jnp.float32),
                   jax.ShapeDtypeStruct((n, 8, 128), jnp.float32)),
        grid=(n,),
        in_specs=[
            pl.BlockSpec((1, 3, hpw, cmid), lambda i: (i, 0, 0, 0)),
            pl.BlockSpec((9, cmid, cout), lambda i: (0, 0, 0)),
            pl.BlockSpec((1, cout), lambda i: (0, 0)),
            pl.BlockSpec((1, H * W, ch), lambda i: (i, 0, 0)),
        ],
        out_specs=(pl.BlockSpec((1, H * W, ch), lambda i: (i, 0, 0)),
                   pl.BlockSpec((1, 8, 128), lambda i: (i, 0, 0))),
        compiler_params=pltpu.CompilerParams(dimension_semantics=("parallel",)),
    )(xcs, wz, bz, in_b_flat)
    return out_b, ld[:, 0, 0]


def gauss_logp_sum(x_flat, prior_flat):
    n, hw, c = x_flat.shape
    if prior_flat.shape[0] == 1:
        prior_idx = lambda i: (0, 0, 0)
    else:
        prior_idx = lambda i: (i, 0, 0)
    lp = pl.pallas_call(
        functools.partial(_gauss_kernel, c=c),
        out_shape=jax.ShapeDtypeStruct((n, 8, 128), jnp.float32),
        grid=(n,),
        in_specs=[
            pl.BlockSpec((1, hw, c), lambda i: (i, 0, 0)),
            pl.BlockSpec((1, hw, 2 * c), prior_idx),
        ],
        out_specs=pl.BlockSpec((1, 8, 128), lambda i: (i, 0, 0)),
        compiler_params=pltpu.CompilerParams(dimension_semantics=("parallel",)),
    )(x_flat, prior_flat)
    return lp[:, 0, 0]


def actnorm_stats(x_flat):
    """Single-pass per-channel (sum, sum of squares)."""
    m, c = x_flat.shape
    tm = min(512, _ru(m, 8))
    mp = _ru(m, tm)
    xp = jnp.pad(x_flat, ((0, mp - m), (0, 0)))
    s1, s2 = pl.pallas_call(
        _stats_kernel,
        out_shape=(jax.ShapeDtypeStruct((1, c), jnp.float32),
                   jax.ShapeDtypeStruct((1, c), jnp.float32)),
        grid=(mp // tm,),
        in_specs=[pl.BlockSpec((tm, c), lambda i: (i, 0))],
        out_specs=(pl.BlockSpec((1, c), lambda i: (0, 0)),
                   pl.BlockSpec((1, c), lambda i: (0, 0))),
        compiler_params=pltpu.CompilerParams(dimension_semantics=("arbitrary",)),
    )(xp)
    return s1[0], s2[0]


def matmul_bias_f32(x, w, b):
    """(M,K)@(K,N)+bias in f32 (ActNorm-fused invertible 1x1 conv; K,N = c small)."""
    m, k = x.shape
    _, nc = w.shape
    tm = min(256, max(8, _ru((m + 1) // 2, 8)))   # >=2 grid steps when possible
    mp = _ru(m, tm)
    xp = jnp.pad(x, ((0, mp - m), (0, 0)))
    out = pl.pallas_call(
        _mm_bias_kernel,
        out_shape=jax.ShapeDtypeStruct((mp, nc), jnp.float32),
        grid=(mp // tm,),
        in_specs=[pl.BlockSpec((tm, k), lambda i: (i, 0)),
                  pl.BlockSpec((k, nc), lambda i: (0, 0)),
                  pl.BlockSpec((1, nc), lambda i: (0, 0))],
        out_specs=pl.BlockSpec((tm, nc), lambda i: (i, 0)),
        compiler_params=pltpu.CompilerParams(dimension_semantics=("parallel",)),
    )(xp, w.astype(jnp.float32), b.reshape(1, nc).astype(jnp.float32))
    return out[:m]


# ---------------------------------------------------------------------------
# Glow module forward (NHWC internal, NCHW public)
# ---------------------------------------------------------------------------
def flow_forward(x, p):
    """x: (N,H,W,c) f32. ActNorm (data-dependent init) + InvConv2dLU + AffineCoupling."""
    n, h, w, c = x.shape
    m = n * h * w
    x_flat = x.reshape(m, c)

    # ActNorm statistics (single fused pass), folded into the 1x1 conv matmul.
    s1, s2 = actnorm_stats(x_flat)
    mean = s1 / m
    var = (s2 - m * mean * mean) / (m - 1)                      # unbiased (torch.std)
    std = jnp.sqrt(jnp.maximum(var, 0.0))
    loc = -mean
    scale = 1.0 / (std + 1e-6)

    w_t = p['invconv']['w_t']
    w_eff = scale[:, None] * w_t
    b_eff = (scale * loc) @ w_t
    out = matmul_bias_f32(x_flat, w_eff, b_eff).reshape(n, h, w, c)
    det01 = (h * w) * (jnp.sum(jnp.log(jnp.abs(scale))) + p['invconv']['sum_w_s'])

    # Affine coupling: conv1+relu+conv2+relu fused; zero-conv + coupling fused.
    cp = p['coupling']
    ch = c // 2
    in_a = out[..., :ch]
    in_b_flat = out[..., ch:].reshape(n, h * w, ch)

    xcs1 = _col_shifted(in_a.astype(jnp.bfloat16), 0.0)
    hdd = conv3x3_mm(xcs1, cp['w1'], cp['b1'], cp['w2'], cp['b2'], h, w)
    xcs2 = _col_shifted(hdd.reshape(n, h, w, -1), 1.0)          # ZeroConv2d pad value=1
    out_b_flat, ld_c = zeroconv_coupling(xcs2, cp['wz'], cp['bz'], in_b_flat, h, w)

    out2 = jnp.concatenate([in_a.reshape(n, h * w, ch), out_b_flat],
                           axis=-1).reshape(n, h, w, c)
    return out2, det01 + ld_c


def block_forward(x, p):
    n, h, w, c = x.shape
    # squeeze (matches NCHW view/permute channel ordering: c*4 + s1*2 + s2)
    out = x.reshape(n, h // 2, 2, w // 2, 2, c).transpose(0, 1, 3, 5, 2, 4)
    out = out.reshape(n, h // 2, w // 2, c * 4)
    logdet = jnp.zeros((n,), jnp.float32)
    for fp in p['flows']:
        out, det = flow_forward(out, fp)
        logdet = logdet + det
    hs, ws, cs = out.shape[1], out.shape[2], out.shape[3]
    if p['split']:
        half = cs // 2
        out_keep = out[..., :half]
        z_new = out[..., half:]
        xcs = _col_shifted(out_keep.astype(jnp.bfloat16), 1.0)
        prior_out = conv3x3(xcs, p['prior']['w'], p['prior']['b'], hs, ws,
                            out_dtype=jnp.float32)              # (n, hs*ws, cs)
        log_p = gauss_logp_sum(z_new.reshape(n, hs * ws, half), prior_out)
        out_next = out_keep
    else:
        # Prior input is a constant (zeros padded with 1.0): compute once at
        # batch=1 and broadcast through the gaussian kernel's index_map.
        zeros = jnp.zeros((1, hs, ws, cs), jnp.bfloat16)
        xcs = _col_shifted(zeros, 1.0)
        prior_map = conv3x3(xcs, p['prior']['w'], p['prior']['b'], hs, ws,
                            out_dtype=jnp.float32)              # (1, hs*ws, 2cs)
        log_p = gauss_logp_sum(out.reshape(n, hs * ws, cs), prior_map)
        z_new = out
        out_next = out
    return out_next, logdet, log_p, z_new


def glow_forward(x_nchw, params):
    n = x_nchw.shape[0]
    out = jnp.transpose(x_nchw, (0, 2, 3, 1)).astype(jnp.float32)   # NCHW -> NHWC
    log_p_sum = jnp.zeros((n,), jnp.float32)
    logdet = jnp.zeros((n,), jnp.float32)
    z_outs = []
    for bp in params['blocks']:
        out, det, log_p, z_new = block_forward(out, bp)
        z_outs.append(jnp.transpose(z_new, (0, 3, 1, 2)))           # back to NCHW
        logdet = logdet + det
        log_p_sum = log_p_sum + log_p
    return log_p_sum, logdet, z_outs


# ---------------------------------------------------------------------------
# Deterministic parameter init (mirrors Glow.__init__); matmul-ready, bf16,
# gains folded - computed once here instead of per forward.
# ---------------------------------------------------------------------------
def _to_taps(w_oikk):
    """(Cout, Cin, 3, 3) -> (9, Cin, Cout) with tap index di*3 + dj."""
    co, ci = w_oikk.shape[0], w_oikk.shape[1]
    return jnp.transpose(w_oikk, (2, 3, 1, 0)).reshape(9, ci, co)


def init_glow(key, in_channel, n_flow, n_block, filter_size=512):
    blocks = []
    n_channel = in_channel
    for b in range(n_block):
        split = (b != n_block - 1)
        squeeze_dim = n_channel * 4
        flows = []
        for _ in range(n_flow):
            key, kq, kc1, kc2 = jax.random.split(key, 4)
            c = squeeze_dim
            # InvConv2dLU: random -> QR -> LU; fused weight precomputed (glue).
            w = jax.random.normal(kq, (c, c), jnp.float32)
            q, _ = jnp.linalg.qr(w)
            w_p, w_l, w_u_full = jax.scipy.linalg.lu(q)
            w_s_diag = jnp.diag(w_u_full)
            u_mask = jnp.triu(jnp.ones((c, c), jnp.float32), 1)
            l_mask = u_mask.T
            w_s = jnp.log(jnp.abs(w_s_diag))
            s_sign = jnp.sign(w_s_diag)
            w_u = jnp.triu(w_u_full, 1)
            weight = w_p @ (w_l * l_mask + jnp.eye(c, dtype=jnp.float32)) @ (
                w_u * u_mask + jnp.diag(s_sign * jnp.exp(w_s)))
            invconv = dict(w_t=weight.T.astype(jnp.float32),
                           sum_w_s=jnp.sum(w_s).astype(jnp.float32))

            ch = c // 2
            conv1_w = 0.05 * jax.random.normal(kc1, (filter_size, ch, 3, 3),
                                               jnp.float32)
            conv2_w = 0.05 * jax.random.normal(kc2, (filter_size, filter_size, 1, 1),
                                               jnp.float32)
            zero_w = jnp.zeros((c, filter_size, 3, 3), jnp.float32)
            zero_gain = jnp.exp(jnp.zeros((c,), jnp.float32) * 3.0)   # scale=0
            coupling = dict(
                w1=_to_taps(conv1_w).astype(jnp.bfloat16),
                b1=jnp.zeros((1, filter_size), jnp.float32),
                w2=conv2_w.reshape(filter_size, filter_size).T.astype(jnp.bfloat16),
                b2=jnp.zeros((1, filter_size), jnp.float32),
                wz=(_to_taps(zero_w) * zero_gain[None, None, :]).astype(jnp.bfloat16),
                bz=(jnp.zeros((c,), jnp.float32) * zero_gain).reshape(1, c),
            )
            flows.append(dict(invconv=invconv, coupling=coupling))

        if split:
            pcout, pcin = n_channel * 4, n_channel * 2
        else:
            pcout, pcin = n_channel * 8, n_channel * 4
        p_w = jnp.zeros((pcout, pcin, 3, 3), jnp.float32)
        p_gain = jnp.exp(jnp.zeros((pcout,), jnp.float32) * 3.0)
        prior = dict(w=(_to_taps(p_w) * p_gain[None, None, :]).astype(jnp.bfloat16),
                     b=(jnp.zeros((pcout,), jnp.float32) * p_gain).reshape(1, pcout))

        blocks.append(dict(split=split, flows=flows, prior=prior))
        if split:
            n_channel *= 2
    return dict(blocks=blocks)


if __name__ == "__main__":
    key = jax.random.PRNGKey(0)
    k_x, k_p = jax.random.split(key)

    # small but shape-consistent: batch=2, channels=4, 16x16, n_flow=2, n_block=2
    x = jax.random.normal(k_x, (2, 4, 16, 16), jnp.float32)
    params = init_glow(k_p, in_channel=4, n_flow=2, n_block=2, filter_size=512)

    log_p_sum, logdet, z_outs = glow_forward(x, params)
    jax.block_until_ready(log_p_sum)
    jax.block_until_ready(logdet)
    for z in z_outs:
        jax.block_until_ready(z)

    assert log_p_sum.shape == (2,) and logdet.shape == (2,)
    assert z_outs[0].shape == (2, 8, 8, 8) and z_outs[1].shape == (2, 32, 4, 4)
    assert bool(jnp.all(jnp.isfinite(log_p_sum))) and bool(jnp.all(jnp.isfinite(logdet)))
    print("KERNEL_OK")
</pallas_src>

<mosaic_0001>
module attributes {stable_mosaic.version = 11 : i64} {
  func.func @_stats_kernel(%arg0: i32, %arg1: memref<128x16xf32, #tpu.memory_space<vmem>>, %arg2: memref<1x16xf32, #tpu.memory_space<vmem>>, %arg3: memref<1x16xf32, #tpu.memory_space<vmem>>) attributes {dimension_semantics = [#tpu.dimension_semantics<arbitrary>], iteration_bounds = array<i64: 1>, scalar_prefetch = 0 : i64, scratch_operands = 0 : i64, tpu.core_type = #tpu.core_type<tc>, window_params = [{transform_indices = @transform_0, window_bounds = array<i64: 128, 16>}, {pipeline_mode = #tpu.pipeline_mode<synchronous>, transform_indices = @transform_1, window_bounds = array<i64: 1, 16>}, {pipeline_mode = #tpu.pipeline_mode<synchronous>, transform_indices = @transform_2, window_bounds = array<i64: 1, 16>}]} {
    %c0_i32 = arith.constant 0 : i32
    %0 = arith.cmpi eq, %arg0, %c0_i32 : i32
    %1 = arith.extui %0 : i1 to i32
    %c0_i32_0 = arith.constant 0 : i32
    %2 = arith.cmpi ne, %1, %c0_i32_0 : i32
    scf.if %2 {
      %cst_11 = arith.constant 0.000000e+00 : f32
      %15 = vector.broadcast %cst_11 : f32 to vector<1x16xf32>
      %c0_12 = arith.constant 0 : index
      %c0_13 = arith.constant 0 : index
      %16 = vector.load %arg2[%c0_12, %c0_13] : memref<1x16xf32, #tpu.memory_space<vmem>>, vector<1x16xf32>
      tpu.vector_store %arg2[%c0_12, %c0_13], %15 {strides = array<i32>} : memref<1x16xf32, #tpu.memory_space<vmem>>, vector<1x16xf32>,
      %cst_14 = arith.constant 0.000000e+00 : f32
      %17 = vector.broadcast %cst_14 : f32 to vector<1x16xf32>
      %c0_15 = arith.constant 0 : index
      %c0_16 = arith.constant 0 : index
      %18 = vector.load %arg3[%c0_15, %c0_16] : memref<1x16xf32, #tpu.memory_space<vmem>>, vector<1x16xf32>
      tpu.vector_store %arg3[%c0_15, %c0_16], %17 {strides = array<i32>} : memref<1x16xf32, #tpu.memory_space<vmem>>, vector<1x16xf32>,
    } else {
    }
    %c0 = arith.constant 0 : index
    %c0_1 = arith.constant 0 : index
    %3 = vector.load %arg1[%c0, %c0_1] : memref<128x16xf32, #tpu.memory_space<vmem>>, vector<128x16xf32>
    %c0_2 = arith.constant 0 : index
    %c0_3 = arith.constant 0 : index
    %4 = vector.load %arg2[%c0_2, %c0_3] : memref<1x16xf32, #tpu.memory_space<vmem>>, vector<1x16xf32>
    %cst = arith.constant dense<0.000000e+00> : vector<16xf32>
    %5 = vector.multi_reduction <add>, %3, %cst [0] : vector<128x16xf32> to vector<16xf32>
    %6 = vector.shape_cast %5 : vector<16xf32> to vector<1x16xf32>
    %7 = arith.addf %4, %6 : vector<1x16xf32>
    %c0_4 = arith.constant 0 : index
    %c0_5 = arith.constant 0 : index
    %8 = vector.load %arg2[%c0_4, %c0_5] : memref<1x16xf32, #tpu.memory_space<vmem>>, vector<1x16xf32>
    tpu.vector_store %arg2[%c0_4, %c0_5], %7 {strides = array<i32>} : memref<1x16xf32, #tpu.memory_space<vmem>>, vector<1x16xf32>,
    %c0_6 = arith.constant 0 : index
    %c0_7 = arith.constant 0 : index
    %9 = vector.load %arg3[%c0_6, %c0_7] : memref<1x16xf32, #tpu.memory_space<vmem>>, vector<1x16xf32>
    %10 = arith.mulf %3, %3 : vector<128x16xf32>
    %cst_8 = arith.constant dense<0.000000e+00> : vector<16xf32>
    %11 = vector.multi_reduction <add>, %10, %cst_8 [0] : vector<128x16xf32> to vector<16xf32>
    %12 = vector.shape_cast %11 : vector<16xf32> to vector<1x16xf32>
    %13 = arith.addf %9, %12 : vector<1x16xf32>
    %c0_9 = arith.constant 0 : index
    %c0_10 = arith.constant 0 : index
    %14 = vector.load %arg3[%c0_9, %c0_10] : memref<1x16xf32, #tpu.memory_space<vmem>>, vector<1x16xf32>
    tpu.vector_store %arg3[%c0_9, %c0_10], %13 {strides = array<i32>} : memref<1x16xf32, #tpu.memory_space<vmem>>, vector<1x16xf32>,
    return
  }
  func.func @transform_0(%arg0: i32) -> (i32, i32) {
    %c0_i32 = arith.constant 0 : i32
    %c0_i32_0 = arith.constant 0 : i32
    return %arg0, %c0_i32 : i32, i32
  }
  func.func @transform_1(%arg0: i32) -> (i32, i32) {
    %c0_i32 = arith.constant 0 : i32
    %c0_i32_0 = arith.constant 0 : i32
    %c0_i32_1 = arith.constant 0 : i32
    return %c0_i32, %c0_i32_0 : i32, i32
  }
  func.func @transform_2(%arg0: i32) -> (i32, i32) {
    %c0_i32 = arith.constant 0 : i32
    %c0_i32_0 = arith.constant 0 : i32
    %c0_i32_1 = arith.constant 0 : i32
    return %c0_i32, %c0_i32_0 : i32, i32
  }
}

</mosaic_0001>

<bundles_post_ra>
// kernel: tpu_custom_call.1
= control target key start
LH: loop header
LB: loop body
LE: loop exit
PB: predicated region body
PF: predicated region fallthrough
CT: control target
= control target key end

     0   :  { %8 = vsyncpa [#allocation3], 0  ;;  %vm16_vm0 = vcmask 122880   ;;  %vm36_vm1 = vcmask 130048   ;;  %v208_v3 = vmov 0.0   ;;  %s316_s0 = inlined_call_operand.vmem [shape: f32[128,16], index: 0, kind: input, shape index: {}]   ;;  %s317_s1 = inlined_call_operand.hbm [shape: f32[1,16], index: 1, kind: output, shape index: {0}]   ;;  %s318_s2 = inlined_call_operand.hbm [shape: f32[1,16], index: 2, kind: output, shape index: {1}]  }
   0x1   :  { %v19_v0 = vld [vmem:[%s316_s0] sm:$0xff]  ;;  %v20_v1 = vld [vmem:[%s316_s0 + $0x8] sm:$0xff]  ;;  %v21_v2 = vld [vmem:[%s316_s0 + $0x10] sm:$0xff]  ;;  %17 = vst.msk [vmem:[#allocation2] sm:$0x1] %vm16_vm0, %v208_v3 }
   0x2   :  { %18 = vst.msk [vmem:[#allocation4] sm:$0x1] %vm16_vm0, %v208_v3  ;;  %v37_v4 = vsel %vm36_vm1, %v19_v0, 0.0  ;;  %v38_v5 = vsel %vm36_vm1, %v20_v1, 0.0  ;;  %v40_v6 = vsel %vm36_vm1, %v21_v2, 0.0  ;;  %v22_v7 = vld [vmem:[%s316_s0 + $0x18] sm:$0xff]  ;;  %v78_v15 = vmul.f32 %v19_v0, %v19_v0 }
   0x3   :  { %v39_v8 = vadd.f32 %v38_v5, %v37_v4  ;;  %v42_v9 = vsel %vm36_vm1, %v22_v7, 0.0  ;;  %v23_v10 = vld [vmem:[%s316_s0 + $0x20] sm:$0xff]  ;;  %v24_v13 = vld [vmem:[%s316_s0 + $0x28] sm:$0xff]  ;;  %v79_v16 = vmul.f32 %v20_v1, %v20_v1  ;;  %v80_v17 = vmul.f32 %v21_v2, %v21_v2 }
   0x4   :  { %v44_v12 = vsel %vm36_vm1, %v23_v10, 0.0 }
   0x5   :  { %v41_v11 = vadd.f32 %v40_v6, %v39_v8 }
   0x7   :  { %v43_v14 = vadd.f32 %v42_v9, %v41_v11 }
   0x8   :  { %9 = vsyncpa [#allocation5], 0  ;;  %v46_v18 = vsel %vm36_vm1, %v24_v13, 0.0  ;;  %v25_v19 = vld [vmem:[%s316_s0 + $0x30] sm:$0xff]  ;;  %v81_v21 = vmul.f32 %v22_v7, %v22_v7  ;;  %v82_v23 = vmul.f32 %v23_v10, %v23_v10  ;;  %v26_v24 = vld [vmem:[%s316_s0 + $0x38] sm:$0xff]  ;;  %v94_v26 = vsel %vm36_vm1, %v78_v15, 0.0 }
   0x9   :  { %v45_v20 = vadd.f32 %v44_v12, %v43_v14  ;;  %v48_v22 = vsel %vm36_vm1, %v25_v19, 0.0  ;;  %v95_v27 = vsel %vm36_vm1, %v79_v16, 0.0  ;;  %v97_v28 = vsel %vm36_vm1, %v80_v17, 0.0  ;;  %v27_v31 = vld [vmem:[%s316_s0 + $0x40] sm:$0xff]  ;;  %v28_v37 = vld [vmem:[%s316_s0 + $0x48] sm:$0xff]  ;;  %v29_v43 = vld [vmem:[%s316_s0 + $0x50] sm:$0xff] }
   0xa   :  { %v50_v29 = vsel %vm36_vm1, %v26_v24, 0.0  ;;  %v96_v30 = vadd.f32 %v95_v27, %v94_v26  ;;  %v83_v33 = vmul.f32 %v24_v13, %v24_v13  ;;  %v99_v34 = vsel %vm36_vm1, %v81_v21, 0.0  ;;  %v30_v49 = vld [vmem:[%s316_s0 + $0x58] sm:$0xff]  ;;  %v31_v55 = vld [vmem:[%s316_s0 + $0x60] sm:$0xff]  ;;  %v32_v61 = vld [vmem:[%s316_s0 + $0x68] sm:$0xff] }
   0xb   :  { %v47_v25 = vadd.f32 %v46_v18, %v45_v20  ;;  %v52_v35 = vsel %vm36_vm1, %v27_v31, 0.0  ;;  %v84_v39 = vmul.f32 %v25_v19, %v25_v19  ;;  %v101_v40 = vsel %vm36_vm1, %v82_v23, 0.0  ;;  %v33_v3 = vld [vmem:[%s316_s0 + $0x70] sm:$0xff]  ;;  %v34_v9 = vld [vmem:[%s316_s0 + $0x78] sm:$0xff]  ;;  %s209_s0 = smov [#allocation2]  }
   0xc   :  { %v98_v36 = vadd.f32 %v97_v28, %v96_v30  ;;  %v54_v41 = vsel %vm36_vm1, %v28_v37, 0.0  ;;  %v85_v45 = vmul.f32 %v26_v24, %v26_v24  ;;  %v103_v46 = vsel %vm36_vm1, %v83_v33, 0.0  ;;  %s139_s13 = sshll.u32 %s209_s0, 4  ;;  %s140_s13 = int_to_ptr.vmem [resolvable:$true] %s139_s13 }
   0xd   :  { %v49_v32 = vadd.f32 %v48_v22, %v47_v25  ;;  %v56_v47 = vsel %vm36_vm1, %v29_v43, 0.0  ;;  %v86_v51 = vmul.f32 %v27_v31, %v27_v31  ;;  %v105_v52 = vsel %vm36_vm1, %v84_v39, 0.0  ;;  %s164_s14 = scalar_lea.vmem %s140_s13, 16  ;;  %s168_s15 = scalar_lea.vmem %s140_s13, 32 }
   0xe   :  { %v100_v42 = vadd.f32 %v99_v34, %v98_v36  ;;  %v58_v53 = vsel %vm36_vm1, %v30_v49, 0.0  ;;  %v87_v57 = vmul.f32 %v28_v37, %v28_v37  ;;  %v107_v58 = vsel %vm36_vm1, %v85_v45, 0.0  ;;  %v35_v36 = vld [vmem:[#allocation2] sm:$0x1]  ;;  %p165_p0 = scmp.ne.s32.totalorder %s140_s13, %s164_s14  ;;  %p169_p1 = scmp.lt.s32.totalorder %s140_s13, %s140_s13 }
   0xf   :  { %v51_v38 = vadd.f32 %v50_v29, %v49_v32  ;;  %v60_v59 = vsel %vm36_vm1, %v31_v55, 0.0  ;;  %v88_v63 = vmul.f32 %v29_v43, %v29_v43  ;;  %v109_v0 = vsel %vm36_vm1, %v86_v51, 0.0  ;;  %p170_p2 = scmp.lt.s32.totalorder %s168_s15, %s164_s14 }
  0x10   :  { %v102_v48 = vadd.f32 %v101_v40, %v100_v42  ;;  %v62_v1 = vsel %vm36_vm1, %v32_v61, 0.0  ;;  %v89_v5 = vmul.f32 %v30_v49, %v30_v49  ;;  %v111_v6 = vsel %vm36_vm1, %v87_v57, 0.0 }
  0x11   :  { %v53_v44 = vadd.f32 %v52_v35, %v51_v38  ;;  %v64_v7 = vsel %vm36_vm1, %v33_v3, 0.0  ;;  %v90_v11 = vmul.f32 %v31_v55, %v31_v55  ;;  %v113_v12 = vsel %vm36_vm1, %v88_v63, 0.0  ;;  %p171_p3 = por %p170_p2, %p169_p1 }
  0x12   :  { %v104_v54 = vadd.f32 %v103_v46, %v102_v48  ;;  %v66_v13 = vsel %vm36_vm1, %v34_v9, 0.0  ;;  %v91_v16 = vmul.f32 %v32_v61, %v32_v61  ;;  %v115_v17 = vsel %vm36_vm1, %v89_v5, 0.0 }
  0x13   :  { %v55_v50 = vadd.f32 %v54_v41, %v53_v44  ;;  %v92_v20 = vmul.f32 %v33_v3, %v33_v3  ;;  %v117_v21 = vsel %vm36_vm1, %v90_v11, 0.0  ;;  %v93_v24 = vmul.f32 %v34_v9, %v34_v9  ;;  %p172_p4 = pnand %p171_p3, %p165_p0 }
  0x14   :  { %v106_v60 = vadd.f32 %v105_v52, %v104_v54  ;;  %v119_v25 = vsel %vm36_vm1, %v91_v16, 0.0 }
  0x15   :  { %v57_v56 = vadd.f32 %v56_v47, %v55_v50  ;;  %v121_v28 = vsel %vm36_vm1, %v92_v20, 0.0  ;;  %v123_v31 = vsel %vm36_vm1, %v93_v24, 0.0 }
  0x16   :  { %v108_v2 = vadd.f32 %v107_v58, %v106_v60 }
  0x17   :  { %v59_v62 = vadd.f32 %v58_v53, %v57_v56 }
  0x18   :  { %v110_v8 = vadd.f32 %v109_v0, %v108_v2 }
  0x19   :  { %v61_v4 = vadd.f32 %v60_v59, %v59_v62 }
  0x1a   :  { %v112_v14 = vadd.f32 %v111_v6, %v110_v8 }
  0x1b   :  { %v63_v10 = vadd.f32 %v62_v1, %v61_v4 }
  0x1c   :  { %v114_v18 = vadd.f32 %v113_v12, %v112_v14 }
  0x1d   :  { %v65_v15 = vadd.f32 %v64_v7, %v63_v10 }
  0x1e   :  { %v116_v22 = vadd.f32 %v115_v17, %v114_v18 }
  0x1f   :  { %v67_v19 = vadd.f32 %v66_v13, %v65_v15 }
  0x20   :  { %v118_v26 = vadd.f32 %v117_v21, %v116_v22 }
  0x21   :  { %v68_v23 = vrot.slane %v67_v19, 4 }
  0x22   :  { %v120_v29 = vadd.f32 %v119_v25, %v118_v26 }
  0x23   :  { %v69_v27 = vadd.f32 %v68_v23, %v67_v19 }
  0x24   :  { %v122_v32 = vadd.f32 %v121_v28, %v120_v29 }
  0x25   :  { %v70_v30 = vrot.slane %v69_v27, 2 }
  0x26   :  { %v124_v34 = vadd.f32 %v123_v31, %v122_v32 }
  0x27   :  { %v71_v33 = vadd.f32 %v70_v30, %v69_v27 }
  0x28   :  { %v125_v37 = vrot.slane %v124_v34, 4 }
  0x29   :  { %v72_v35 = vrot.slane %v71_v33, 1 }
  0x2a   :  { %v126_v39 = vadd.f32 %v125_v37, %v124_v34 }
  0x2b   :  { %v73_v38 = vadd.f32 %v72_v35, %v71_v33 }
  0x2c   :  { %v127_v41 = vrot.slane %v126_v39, 2 }
  0x2d   :  { %v74_v40 = vadd.f32 %v73_v38, %v35_v36 }
  0x2e   :  { %v128_v42 = vadd.f32 %v127_v41, %v126_v39 }
  0x2f   :  { %76 = vst.msk [vmem:[#allocation2] sm:$0x1] %vm16_vm0, %v74_v40 }
  0x30   :  { %175 = shalt.err (!%p172_p4)
}
  0x31   :  { %142 = dma.vmem_to_hbm [thread:$0]  %s140_s13, 16, %s317_s1, [#allocation3]   ;;  %v129_v43 = vrot.slane %v128_v42, 1  ;;  %v77_v44 = vld [vmem:[#allocation4] sm:$0x1] }
  0x32   :  { %s210_s18 = smov [#allocation4]  }
  0x33   :  { %s149_s19 = sshll.u32 %s210_s18, 4  ;;  %v130_v45 = vadd.f32 %v129_v43, %v128_v42  ;;  %s150_s19 = int_to_ptr.vmem [resolvable:$true] %s149_s19 }
  0x34   :  { %s184_s20 = scalar_lea.vmem %s150_s19, 16  ;;  %s188_s21 = scalar_lea.vmem %s150_s19, 32 }
  0x35   :  { %v131_v46 = vadd.f32 %v130_v45, %v77_v44  ;;  %p185_p5 = scmp.ne.s32.totalorder %s150_s19, %s184_s20  ;;  %p189_p6 = scmp.lt.s32.totalorder %s150_s19, %s150_s19 }
  0x36   :  { %p190_p7 = scmp.lt.s32.totalorder %s188_s21, %s184_s20 }
  0x37   :  { %132 = vst.msk [vmem:[#allocation4] sm:$0x1] %vm16_vm0, %v131_v46 }
  0x38   :  { %p191_p8 = por %p190_p7, %p189_p6 }
  0x3a   :  { %p192_p9 = pnand %p191_p8, %p185_p5 }
  0x3c   :  { %195 = shalt.err (!%p192_p9)
}
  0x3d   :  { %152 = dma.vmem_to_hbm [thread:$0]  %s150_s19, 16, %s318_s2, [#allocation5]  }
  0x3e   :  { %204 = dma.done.wait [#allocation3], 16  }
  0x3f   :  { %205 = vsyncadd [#allocation3], 4294967280 }
  0x40   :  { %206 = dma.done.wait [#allocation5], 16  }
  0x41   :  { %207 = vsyncadd [#allocation5], 4294967280 }
  0x42   :  { %159 = vsyncpa [#allocation3], 1 }
  0x43   :  { %160 = vsyncpa [#allocation5], 1 }

</bundles_post_ra>
